<compile_context>
chip_gen: v7x
topology: tpu7x:2x2x1
jax: 0.10.0
libtpu: 0.0.40
codegen_flags: <defaults>
</compile_context>

<pallas_src>
import functools

import jax
import jax.numpy as jnp
from jax.experimental import pallas as pl
from jax.experimental.pallas import tpu as pltpu


# ----------------------------- helpers ---------------------------------------

def _round_up(a: int, b: int) -> int:
    return ((a + b - 1) // b) * b


def _choose_tm(M: int, tm_max: int = 512) -> int:
    """Row tile: as large as possible, but keep >= 2 grid steps when we can
    (v7x megacore wants at least 2 'parallel' steps to feed both TCs)."""
    if M >= 2 * tm_max:
        return tm_max
    half = _round_up(pl.cdiv(M, 2), 8)
    return max(8, min(tm_max, half))


# ----------------------------- Pallas kernel ---------------------------------

def _convblock_kernel(patches_ref, w_ref, shift_ref, out_ref, *,
                      use_act: bool, alpha: float):
    # MXU matmul: [tm, Kp] @ [Kp, Cp] -> [tm, Cp], f32 accumulation.
    acc = jnp.dot(patches_ref[...], w_ref[...],
                  preferred_element_type=jnp.float32)
    # BN scale is pre-folded into w_ref; epilogue is shift + activation only.
    y = acc + shift_ref[...]
    if use_act:
        # LeakyReLU(0.2) / PReLU(single param) share the same form.
        y = jnp.where(y > 0, y, jnp.float32(alpha) * y)
    out_ref[...] = y.astype(out_ref.dtype)


def _convblock_matmul(patches, w_mat, shift, *, use_act, alpha, out_dtype, tm):
    """patches: [Mp, Kp], w_mat: [Kp, Cp] (scale folded in), shift: [1, Cp]."""
    Mp, Kp = patches.shape
    _, Cp = w_mat.shape
    assert Mp % tm == 0 and Cp % 128 == 0 and Kp % 8 == 0

    # Size the scoped VMEM budget: double-buffered patches + output tiles,
    # resident weight + shift, plus margin.  Clamp to 64 MiB (v7x physical).
    in_isz = patches.dtype.itemsize
    out_isz = jnp.zeros((), out_dtype).dtype.itemsize
    needed = (2 * tm * Kp * in_isz            # patches (double-buffered)
              + 2 * tm * Cp * out_isz         # output  (double-buffered)
              + Kp * Cp * w_mat.dtype.itemsize
              + 4 * Cp * 4)
    vmem_limit = int(min(64 * 1024 * 1024, max(32 * 1024 * 1024, 2 * needed)))

    kernel = functools.partial(_convblock_kernel, use_act=use_act, alpha=alpha)
    return pl.pallas_call(
        kernel,
        out_shape=jax.ShapeDtypeStruct((Mp, Cp), out_dtype),
        grid_spec=pltpu.PrefetchScalarGridSpec(
            num_scalar_prefetch=0,
            grid=(Mp // tm,),
            in_specs=[
                pl.BlockSpec((tm, Kp), lambda i: (i, 0)),   # streamed row tiles
                pl.BlockSpec((Kp, Cp), lambda i: (0, 0)),   # weight: resident
                pl.BlockSpec((1, Cp), lambda i: (0, 0)),    # shift : resident
            ],
            out_specs=pl.BlockSpec((tm, Cp), lambda i: (i, 0)),
        ),
        compiler_params=pltpu.CompilerParams(
            dimension_semantics=("parallel",),
            vmem_limit_bytes=vmem_limit),
    )(patches, w_mat, shift)


# ------------------------------- glue (JAX) ----------------------------------

def _im2col(x, kh, kw, stride, pad):
    """x: NCHW -> patches [N*Ho*Wo, C*kh*kw] (flattened in (C, kh, kw) order)."""
    N, C, H, W = x.shape
    xp = jnp.pad(x, ((0, 0), (0, 0), (pad, pad), (pad, pad)))
    Ho = (H + 2 * pad - kh) // stride + 1
    Wo = (W + 2 * pad - kw) // stride + 1
    cols = []
    for i in range(kh):
        for j in range(kw):
            cols.append(xp[:, :, i:i + stride * Ho:stride, j:j + stride * Wo:stride])
    patches = jnp.stack(cols, axis=0).reshape(kh, kw, N, C, Ho, Wo)
    patches = patches.transpose(2, 4, 5, 3, 0, 1)          # (N, Ho, Wo, C, kh, kw)
    return patches.reshape(N * Ho * Wo, C * kh * kw), Ho, Wo


class ConvBlockPallas:
    """Pallas ConvBlock: Conv2d [+ BatchNorm2d(eval)] [+ LeakyReLU/PReLU]."""

    def __init__(self, in_channels, out_channels, use_bn, use_act, discriminator,
                 kernel_size=3, stride=1, padding=1, key=None):
        self.use_bn = use_bn
        self.use_act = use_act
        self.discriminator = discriminator
        self.kh = self.kw = kernel_size
        self.stride = stride
        self.padding = padding

        k0, k1, k2, k3, k4, k5 = jax.random.split(key, 6)
        fan_in = in_channels * kernel_size * kernel_size
        bound = 1.0 / float(jnp.sqrt(jnp.float32(fan_in)))
        # Conv weight: OIHW (PyTorch convention), deterministic init.
        self.weight = jax.random.uniform(
            k0, (out_channels, in_channels, kernel_size, kernel_size),
            minval=-bound, maxval=bound, dtype=jnp.float32)
        self.bias = (None if use_bn else
                     jax.random.uniform(k1, (out_channels,), minval=-bound,
                                        maxval=bound, dtype=jnp.float32))
        if use_bn:
            # eval-mode BN parameters (deterministic synthetic "running" stats)
            self.gamma = 1.0 + 0.1 * jax.random.normal(k2, (out_channels,), jnp.float32)
            self.beta = 0.1 * jax.random.normal(k3, (out_channels,), jnp.float32)
            self.running_mean = 0.1 * jax.random.normal(k4, (out_channels,), jnp.float32)
            self.running_var = jnp.abs(
                1.0 + 0.1 * jax.random.normal(k5, (out_channels,), jnp.float32))
            self.eps = 1e-5
        # activation parameter as a Python constant (baked into the kernel).
        self.alpha = (0.2 if discriminator else 0.25) if use_act else 0.0

    def _fold_affine(self):
        C_out = self.weight.shape[0]
        if self.use_bn:
            inv_std = 1.0 / jnp.sqrt(self.running_var + self.eps)
            scale = self.gamma * inv_std
            shift = self.beta - self.running_mean * scale
        else:
            scale = jnp.ones((C_out,), jnp.float32)
            shift = self.bias if self.bias is not None else jnp.zeros((C_out,), jnp.float32)
        return scale, shift                                   # both (C_out,)

    def __call__(self, x, compute_dtype=jnp.float32):
        # x: NCHW float32
        N, C_in, H, W = x.shape
        C_out = self.weight.shape[0]
        patches, Ho, Wo = _im2col(x, self.kh, self.kw, self.stride, self.padding)
        M, K = patches.shape

        # weight OIHW -> [C_in*kh*kw, C_out] matching im2col (C, kh, kw) order,
        # with the BN scale (or identity) folded in.
        scale, shift = self._fold_affine()
        w_mat = self.weight.reshape(C_out, K).T * scale[None, :]

        # Lane/sublane-friendly padding: C_out -> mult of 128, K -> mult of 8,
        # M -> mult of the row tile.
        Cp = _round_up(C_out, 128)
        Kp = _round_up(K, 8)
        tm = _choose_tm(M)
        Mp = _round_up(M, tm)

        patches_p = jnp.pad(patches, ((0, Mp - M), (0, Kp - K))).astype(compute_dtype)
        w_p = jnp.pad(w_mat, ((0, Kp - K), (0, Cp - C_out))).astype(compute_dtype)
        shift_p = jnp.pad(shift, (0, Cp - C_out)).reshape(1, Cp).astype(jnp.float32)

        out_flat = _convblock_matmul(
            patches_p, w_p, shift_p,
            use_act=self.use_act, alpha=self.alpha,
            out_dtype=x.dtype, tm=tm)

        # [Mp, Cp] -> [M, C_out] -> NCHW
        out = out_flat[:M, :C_out]
        return out.reshape(N, Ho, Wo, C_out).transpose(0, 3, 1, 2)


# ------------------------------ reference ------------------------------------

def _reference(block: ConvBlockPallas, x):
    dn = jax.lax.conv_dimension_numbers(x.shape, block.weight.shape,
                                        ("NCHW", "OIHW", "NCHW"))
    y = jax.lax.conv_general_dilated(
        x, block.weight, (block.stride, block.stride),
        [(block.padding, block.padding)] * 2, dimension_numbers=dn)
    if block.bias is not None:
        y = y + block.bias[None, :, None, None]
    if block.use_bn:
        inv_std = 1.0 / jnp.sqrt(block.running_var + block.eps)
        y = (y - block.running_mean[None, :, None, None]) * \
            (block.gamma * inv_std)[None, :, None, None] + \
            block.beta[None, :, None, None]
    if block.use_act:
        y = jnp.where(y > 0, y, block.alpha * y)
    return y


# --------------------------------- main ---------------------------------------

if __name__ == "__main__":
    key = jax.random.PRNGKey(0)
    kx, kp = jax.random.split(key)
    x = jax.random.normal(kx, (2, 4, 16, 16), dtype=jnp.float32)  # NCHW

    # SRGAN discriminator-style block: conv3x3 + BN + LeakyReLU(0.2)
    block = ConvBlockPallas(in_channels=4, out_channels=8,
                            use_bn=True, use_act=True, discriminator=True,
                            kernel_size=3, stride=1, padding=1, key=kp)

    ref = _reference(block, x)

    # f32 MXU path (exact semantics check)
    out = block(x)
    jax.block_until_ready(out)
    assert out.shape == ref.shape == (2, 8, 16, 16)
    assert jnp.allclose(out, ref, atol=1e-4, rtol=1e-4), "f32 mismatch vs reference"

    # bf16 MXU path (per perf guidance): bf16 patches/weights, f32 accumulation.
    out_bf16 = block(x, compute_dtype=jnp.bfloat16)
    jax.block_until_ready(out_bf16)
    assert out_bf16.shape == ref.shape
    assert jnp.allclose(out_bf16, ref, atol=5e-2, rtol=5e-2), "bf16 mismatch vs reference"

    print("KERNEL_OK")
</pallas_src>

<mosaic_0001>
module attributes {stable_mosaic.version = 11 : i64} {
  func.func @_convblock_kernel(%arg0: i32, %arg1: memref<256x40xf32, #tpu.memory_space<vmem>>, %arg2: memref<40x128xf32, #tpu.memory_space<vmem>>, %arg3: memref<1x128xf32, #tpu.memory_space<vmem>>, %arg4: memref<256x128xf32, #tpu.memory_space<vmem>>) attributes {dimension_semantics = [#tpu.dimension_semantics<parallel>], iteration_bounds = array<i64: 2>, scalar_prefetch = 0 : i64, scratch_operands = 0 : i64, tpu.core_type = #tpu.core_type<tc>, window_params = [{transform_indices = @transform_0, window_bounds = array<i64: 256, 40>}, {pipeline_mode = #tpu.pipeline_mode<synchronous>, transform_indices = @transform_1, window_bounds = array<i64: 40, 128>}, {pipeline_mode = #tpu.pipeline_mode<synchronous>, transform_indices = @transform_2, window_bounds = array<i64: 1, 128>}, {transform_indices = @transform_3, window_bounds = array<i64: 256, 128>}]} {
    %c0 = arith.constant 0 : index
    %c0_0 = arith.constant 0 : index
    %0 = vector.load %arg1[%c0, %c0_0] : memref<256x40xf32, #tpu.memory_space<vmem>>, vector<256x40xf32>
    %c0_1 = arith.constant 0 : index
    %c0_2 = arith.constant 0 : index
    %1 = vector.load %arg2[%c0_1, %c0_2] : memref<40x128xf32, #tpu.memory_space<vmem>>, vector<40x128xf32>
    %cst = arith.constant dense<0.000000e+00> : vector<256x128xf32>
    %2 = tpu.matmul %0, %1, %cst {dimension_numbers = #tpu.dot_dimension_numbers<[1], [0], [0], [1], [0, 0, 1, 1], [], []>} : vector<256x40xf32>, vector<40x128xf32>, vector<256x128xf32> -> vector<256x128xf32>
    %c0_3 = arith.constant 0 : index
    %c0_4 = arith.constant 0 : index
    %3 = vector.load %arg3[%c0_3, %c0_4] : memref<1x128xf32, #tpu.memory_space<vmem>>, vector<1x128xf32>
    %4 = vector.broadcast %3 : vector<1x128xf32> to vector<256x128xf32>
    %5 = arith.addf %2, %4 : vector<256x128xf32>
    %cst_5 = arith.constant 0.000000e+00 : f32
    %6 = vector.broadcast %cst_5 : f32 to vector<256x128xf32>
    %7 = arith.cmpf ogt, %5, %6 : vector<256x128xf32>
    %cst_6 = arith.constant 2.000000e-01 : f32
    %8 = vector.broadcast %cst_6 : f32 to vector<256x128xf32>
    %9 = arith.mulf %8, %5 : vector<256x128xf32>
    %10 = arith.select %7, %5, %9 : vector<256x128xi1>, vector<256x128xf32>
    %c0_7 = arith.constant 0 : index
    %c0_8 = arith.constant 0 : index
    %11 = vector.load %arg4[%c0_7, %c0_8] : memref<256x128xf32, #tpu.memory_space<vmem>>, vector<256x128xf32>
    tpu.vector_store %arg4[%c0_7, %c0_8], %10 {strides = array<i32>} : memref<256x128xf32, #tpu.memory_space<vmem>>, vector<256x128xf32>,
    return
  }
  func.func @transform_0(%arg0: i32) -> (i32, i32) {
    %c0_i32 = arith.constant 0 : i32
    %c0_i32_0 = arith.constant 0 : i32
    return %arg0, %c0_i32 : i32, i32
  }
  func.func @transform_1(%arg0: i32) -> (i32, i32) {
    %c0_i32 = arith.constant 0 : i32
    %c0_i32_0 = arith.constant 0 : i32
    %c0_i32_1 = arith.constant 0 : i32
    return %c0_i32, %c0_i32_0 : i32, i32
  }
  func.func @transform_2(%arg0: i32) -> (i32, i32) {
    %c0_i32 = arith.constant 0 : i32
    %c0_i32_0 = arith.constant 0 : i32
    %c0_i32_1 = arith.constant 0 : i32
    return %c0_i32, %c0_i32_0 : i32, i32
  }
  func.func @transform_3(%arg0: i32) -> (i32, i32) {
    %c0_i32 = arith.constant 0 : i32
    %c0_i32_0 = arith.constant 0 : i32
    return %arg0, %c0_i32 : i32, i32
  }
}

</mosaic_0001>

<bundles_post_ra>
// kernel: tpu_custom_call.1
= control target key start
LH: loop header
LB: loop body
LE: loop exit
PB: predicated region body
PF: predicated region fallthrough
CT: control target
= control target key end

     0   :  { %8 = vsyncpa [#allocation3], 0  ;;  %s1284_s0 = inlined_call_operand.vmem [shape: f32[512,40], index: 0, kind: input, shape index: {}]   ;;  %s1285_s1 = inlined_call_operand.vmem [shape: f32[40,128], index: 1, kind: input, shape index: {}]   ;;  %s1286_s2 = inlined_call_operand.vmem [shape: f32[1,128], index: 2, kind: input, shape index: {}]   ;;  %s1287_s3 = inlined_call_operand.hbm [shape: f32[512,128], index: 3, kind: output, shape index: {}]  }
   0x1   :  { %10 = vsyncpa [#allocation3 + $0x1], 0  ;;  %s1025_s12 = smov 0   ;;  %s1027_s13 = smov 0  }
   0x2   :  { %s1029_s14 = smov 0   ;;  %s1031_s15 = smov 0  }
   0x3 LB: > { %s1046_s16 = sadd.s32 4294967295, %s1000_s15   ;;  %s742_s17 = sadd.s32 4294967294, %s1000_s15   ;;  %s1000_s15 = sphi %s1031_s15, %s1293_s15   ;;  %s996_s14 = sphi %s1029_s14, %s1292_s14   ;;  %s992_s13 = sphi %s1027_s13, %s1291_s13   ;;  %s988_s12 = sphi %s1025_s12, %s1290_s12  }
   0x4   : > { %s1050_s18 = sadd.s32 1, %s1000_s15   ;;  %s91_s19 = sadd.s32 1, %s996_s14 }
   0x5   : > { %s88_s20 = ssub.s32 %s1000_s15, %s1050_s18  ;;  %p101_p0 = scmp.ne.s32.totalorder %s996_s14, %s992_s13 }
   0x6   : > { %p89_p1 = scmp.eq.s32.totalorder %s88_s20, 0  ;;  %p102_p2 = scmp.eq.s32.totalorder %s1046_s16, 1 }
   0x7   : > { %p107_p3 = scmp.ne.s32.totalorder %s992_s13, %s988_s12  ;;  %p108_p4 = scmp.eq.s32.totalorder %s742_s17, 1 }
   0x8   : > { %s1061_s21 = scalar_select %p89_p1, %s996_s14, %s91_s19  }
   0x9   : > { %p1063_p5 = por %p102_p2, %p101_p0  ;;  %p1067_p6 = por %p108_p4, %p107_p3 }
   0xa   : > { %p745_p7 = scmp.ge.s32.totalorder %s1000_s15, 1  ;;  %p141_p8 = scmp.lt.s32.totalorder %s1000_s15, 3 }
   0xc   : > { %p142_p9 = pnand %p745_p7, %p141_p8 }
   0xd   : > { %v204_v0 = vld [vmem:[%s1285_s1] sm:$0xff] (!%p142_p9)  ;;  %v205_v1 = vld [vmem:[%s1285_s1 + $0x8] sm:$0xff] (!%p142_p9)  ;;  %v206_v2 = vld [vmem:[%s1285_s1 + $0x10] sm:$0xff] (!%p142_p9)  ;;  %s747_s30 = sshll.u32 (!%p142_p9), %s1046_s16, 5  ;;  %vm216_vm0 = vcmask (!%p142_p9), 326656   ;;  %s162_s17 = sand.u32 (!%p142_p9), 1, %s992_s13  }
   0xe   : > { %145 = sbr.rel (%p142_p9) target bundleno = 291 (0x123), region = 32  ;;  %v883_v3 = vpack.c.bf16 (!%p142_p9), %v205_v1, %v204_v0  ;;  %v207_v4 = vld [vmem:[%s1285_s1 + $0x18] sm:$0xff] (!%p142_p9)  ;;  %p166_p10 = scmp.lt.s32.totalorder (!%p142_p9), %s747_s30, 63  ;;  %v208_v6 = vld [vmem:[%s1285_s1 + $0x20] sm:$0xff] (!%p142_p9) }
   0xf   : > { %v887_v5 = vpack.c.bf16 (!%p142_p9), %v207_v4, %v206_v2  ;;  %v1162_v39 = vld [vmem:[%s1286_s2] ss:$0 sm:$0xff] (!%p142_p9)  ;;  %s746_s24 = sshll.u32 (!%p142_p9), %s162_s17, 8  ;;  %s787_s26 = sshll.u32 (!%p142_p9), %s1046_s16, 12 }
  0x10   : > { %884 = vmatprep.subr.bf16.mxu0 (!%p142_p9), %v883_v3  ;;  %891 = vmatprep.subr.bf16.mxu1 (!%p142_p9), %v883_v3  ;;  %s1170_s25 = scalar_lea.vmem (!%p142_p9), [#allocation2], %s746_s24  ;;  %s1233_s29 = scalar_lea.hbm (!%p142_p9), %s1287_s3, %s787_s26 }
  0x11   : > { %886 = vmatpush3.bf16.msra.mxu0 (!%p142_p9), %v883_v3  ;;  %894 = vmatpush3.bf16.msra.mxu1 (!%p142_p9), %v883_v3  ;;  %s680_s27 = sshll.u32 (!%p142_p9), %s1170_s25, 4  ;;  %s1002_s5 = smov (!%p142_p9), [#allocation2]   ;;  %s1235_s27 = int_to_ptr.vmem [resolvable:$true] %s680_s27 }
  0x12   : > { %888 = vmatprep.subr.bf16.mxu0 (!%p142_p9), %v887_v5  ;;  %892 = vmatprep.subr.bf16.mxu1 (!%p142_p9), %v887_v5  ;;  %s938_s4 = scalar_lea.vmem (!%p142_p9), %s1235_s27, 4096 }
  0x13   : > { %p939_p11 = scmp.ne.s32.totalorder (!%p142_p9), %s1235_s27, %s938_s4 }
  0x15   : > { %s1295_s30 = smov (!%p166_p10, %s747_s30), 63  ;;  %890 = vmatpush3.bf16.msra.mxu0 %v887_v5  ;;  %895 = vmatpush3.bf16.msra.mxu1 %v887_v5  ;;  %p940_p12 = pnand %p939_p11, %p1063_p5 }
  0x16   : > { %s748_s6 = sshll.u32 %s1295_s30, 3  ;;  %833 = vmatprep.subr.mxu0 %v208_v6  ;;  %893 = vmatprep.subr.mxu1 %v208_v6  ;;  %s1243_s30 = scalar_lea.sflag [#allocation3], %s162_s17 }
  0x17   : > { %s1092_s11 = scalar_lea.vmem %s1284_s0, %s748_s6  ;;  %p941_p13 = pneg %p940_p12 }
  0x18   : > { %v172_v7 = vld [vmem:[%s1092_s11] sm:$0xff]  ;;  %v173_v9 = vld [vmem:[%s1092_s11 + $0x8] sm:$0xff]  ;;  %v174_v11 = vld [vmem:[%s1092_s11 + $0x10] sm:$0xff]  ;;  %s942_s6 = sshll.u32 %s1002_s5, 4  ;;  %s943_s6 = int_to_ptr.vmem [resolvable:$false] %s942_s6 }
  0x19   : > { %v188_v8 = vld [vmem:[%s1092_s11 + $0x80] sm:$0xff]  ;;  %835 = vmatprep.mubr.msk.f32.mxu0 %vm216_vm0, %v172_v7  ;;  %v189_v10 = vld [vmem:[%s1092_s11 + $0x88] sm:$0xff]  ;;  %v190_v12 = vld [vmem:[%s1092_s11 + $0x90] sm:$0xff]  ;;  %834 = vmatpush3.msra.mxu0 %v208_v6  ;;  %s944_s7 = scalar_lea.vmem %s943_s6, 8192  ;;  %p945_p0 = scmp.lt.s32.totalorder %s1235_s27, %s943_s6 }
  0x1a   : > { %859 = vmatprep.mubr.msk.f32.mxu1 %vm216_vm0, %v188_v8  ;;  %896 = vmatpush3.msra.mxu1 %v208_v6  ;;  %v175_v13 = vld [vmem:[%s1092_s11 + $0x18] sm:$0xff]  ;;  %v176_v15 = vld [vmem:[%s1092_s11 + $0x20] sm:$0xff]  ;;  %v177_v17 = vld [vmem:[%s1092_s11 + $0x28] sm:$0xff]  ;;  %p946_p1 = scmp.lt.s32.totalorder %s944_s7, %s938_s4 }
  0x1b   : > { %836 = vmatmul.mubr.msk.f32.vlgmr.msra.gmra.mrb[0].mxu0 %vm216_vm0, %v173_v9  ;;  %860 = vmatmul.mubr.msk.f32.vlgmr.msra.gmra.mrb[0].mxu1 %vm216_vm0, %v189_v10  ;;  %v191_v14 = vld [vmem:[%s1092_s11 + $0x98] sm:$0xff]  ;;  %v192_v16 = vld [vmem:[%s1092_s11 + $0xa0] sm:$0xff]  ;;  %v193_v18 = vld [vmem:[%s1092_s11 + $0xa8] sm:$0xff] }
  0x1c   : > { %838 = vmatprep.mubr.msk.f32.mxu0 %vm216_vm0, %v174_v11  ;;  %862 = vmatprep.mubr.msk.f32.mxu1 %vm216_vm0, %v190_v12  ;;  %v178_v19 = vld [vmem:[%s1092_s11 + $0x30] sm:$0xff]  ;;  %v179_v21 = vld [vmem:[%s1092_s11 + $0x38] sm:$0xff]  ;;  %v180_v23 = vld [vmem:[%s1092_s11 + $0x40] sm:$0xff]  ;;  %p947_p2 = por %p946_p1, %p945_p0 }
  0x1d   : > { %v194_v20 = vld [vmem:[%s1092_s11 + $0xb0] sm:$0xff]  ;;  %v195_v22 = vld [vmem:[%s1092_s11 + $0xb8] sm:$0xff]  ;;  %v196_v24 = vld [vmem:[%s1092_s11 + $0xc0] sm:$0xff] }
  0x1e   : > { %v181_v25 = vld [vmem:[%s1092_s11 + $0x48] sm:$0xff]  ;;  %v182_v27 = vld [vmem:[%s1092_s11 + $0x50] sm:$0xff]  ;;  %v183_v29 = vld [vmem:[%s1092_s11 + $0x58] sm:$0xff]  ;;  %p948_p3 = pnand %p947_p2, %p941_p13 }
  0x1f   : > { %839 = vmatmul.mubr.msk.f32.gmra.mrb[2].mxu0 %vm216_vm0, %v175_v13  ;;  %863 = vmatmul.mubr.msk.f32.gmra.mrb[2].mxu1 %vm216_vm0, %v191_v14  ;;  %v197_v26 = vld [vmem:[%s1092_s11 + $0xc8] sm:$0xff]  ;;  %v198_v28 = vld [vmem:[%s1092_s11 + $0xd0] sm:$0xff]  ;;  %v199_v30 = vld [vmem:[%s1092_s11 + $0xd8] sm:$0xff] }
  0x20   : > { %841 = vmatprep.mubr.msk.f32.mxu0 %vm216_vm0, %v176_v15  ;;  %865 = vmatprep.mubr.msk.f32.mxu1 %vm216_vm0, %v192_v16  ;;  %v184_v31 = vld [vmem:[%s1092_s11 + $0x60] sm:$0xff]  ;;  %v185_v33 = vld [vmem:[%s1092_s11 + $0x68] sm:$0xff]  ;;  %v186_v35 = vld [vmem:[%s1092_s11 + $0x70] sm:$0xff] }
  0x21   : > { %v200_v32 = vld [vmem:[%s1092_s11 + $0xe0] sm:$0xff]  ;;  %v201_v34 = vld [vmem:[%s1092_s11 + $0xe8] sm:$0xff]  ;;  %v202_v36 = vld [vmem:[%s1092_s11 + $0xf0] sm:$0xff] }
  0x22   : > { %v187_v37 = vld [vmem:[%s1092_s11 + $0x78] sm:$0xff] }
  0x23   : > { %842 = vmatmul.mubr.msk.f32.gmra.mrb[4].mxu0 %vm216_vm0, %v177_v17  ;;  %866 = vmatmul.mubr.msk.f32.gmra.mrb[4].mxu1 %vm216_vm0, %v193_v18  ;;  %v203_v38 = vld [vmem:[%s1092_s11 + $0xf8] sm:$0xff] }
  0x24   : > { %844 = vmatprep.mubr.msk.f32.mxu0 %vm216_vm0, %v178_v19  ;;  %868 = vmatprep.mubr.msk.f32.mxu1 %vm216_vm0, %v194_v20 }
  0x27   : > { %845 = vmatmul.mubr.msk.f32.gmra.mrb[6].mxu0 %vm216_vm0, %v179_v21  ;;  %869 = vmatmul.mubr.msk.f32.gmra.mrb[6].mxu1 %vm216_vm0, %v195_v22 }
  0x28   : > { %847 = vmatprep.mubr.msk.f32.mxu0 %vm216_vm0, %v180_v23  ;;  %871 = vmatprep.mubr.msk.f32.mxu1 %vm216_vm0, %v196_v24 }
  0x2b   : > { %848 = vmatmul.mubr.msk.f32.gmra.mrb[8].mxu0 %vm216_vm0, %v181_v25  ;;  %872 = vmatmul.mubr.msk.f32.gmra.mrb[8].mxu1 %vm216_vm0, %v197_v26 }
  0x2c   : > { %850 = vmatprep.mubr.msk.f32.mxu0 %vm216_vm0, %v182_v27  ;;  %874 = vmatprep.mubr.msk.f32.mxu1 %vm216_vm0, %v198_v28 }
  0x2f   : > { %851 = vmatmul.mubr.msk.f32.gmra.mrb[10].mxu0 %vm216_vm0, %v183_v29  ;;  %875 = vmatmul.mubr.msk.f32.gmra.mrb[10].mxu1 %vm216_vm0, %v199_v30 }
  0x30   : > { %853 = vmatprep.mubr.msk.f32.mxu0 %vm216_vm0, %v184_v31  ;;  %877 = vmatprep.mubr.msk.f32.mxu1 %vm216_vm0, %v200_v32 }
  0x33   : > { %854 = vmatmul.mubr.msk.f32.gmra.mrb[12].mxu0 %vm216_vm0, %v185_v33  ;;  %878 = vmatmul.mubr.msk.f32.gmra.mrb[12].mxu1 %vm216_vm0, %v201_v34 }
  0x34   : > { %856 = vmatprep.mubr.msk.f32.mxu0 %vm216_vm0, %v186_v35  ;;  %880 = vmatprep.mubr.msk.f32.mxu1 %vm216_vm0, %v202_v36 }
  0x37   : > { %857 = vmatmul.mubr.msk.f32.gmra.mrb[14].mxu0 %vm216_vm0, %v187_v37  ;;  %881 = vmatmul.mubr.msk.f32.gmra.mrb[14].mxu1 %vm216_vm0, %v203_v38 }
  0xee   : > { %v837_v40 = vpop.f32.mrb[0].mxu0  ;;  %v861_v41 = vpop.f32.mrb[0].mxu1 }
  0xef   : > { %v385_v42 = vadd.f32 %v837_v40, %v1162_v39  ;;  %v465_v43 = vadd.f32 %v861_v41, %v1162_v39  ;;  %v379_v44 = vpop.f32.mrb[1].mxu0  ;;  %v459_v45 = vpop.f32.mrb[1].mxu1 }
  0xf0   : > { %v380_v46 = vadd.f32 %v1162_v39, %v379_v44  ;;  %v460_v47 = vadd.f32 %v1162_v39, %v459_v45 }
  0xf1   : > { %vm539_vm1 = vcmp.gt.f32.partialorder %v385_v42, 0.0  ;;  %v571_v48 = vmul.f32 0.2, %v385_v42  ;;  %vm555_vm2 = vcmp.gt.f32.partialorder %v465_v43, 0.0  ;;  %v587_v49 = vmul.f32 0.2, %v465_v43 }
  0xf2   : > { %vm538_vm3 = vcmp.gt.f32.partialorder %v380_v46, 0.0  ;;  %v570_v50 = vmul.f32 0.2, %v380_v46  ;;  %vm554_vm4 = vcmp.gt.f32.partialorder %v460_v47, 0.0  ;;  %v586_v51 = vmul.f32 0.2, %v460_v47 }
  0xf3   : > { %v603_v52 = vsel %vm539_vm1, %v385_v42, %v571_v48  ;;  %v619_v53 = vsel %vm555_vm2, %v465_v43, %v587_v49  ;;  %v840_v54 = vpop.f32.mrb[2].mxu0  ;;  %v864_v55 = vpop.f32.mrb[2].mxu1 }
  0xf4   : > { %635 = vst [vmem:[%s1170_s25 + $0x8] sm:$0xff] %v603_v52  ;;  %651 = vst [vmem:[%s1170_s25 + $0x88] sm:$0xff] %v619_v53  ;;  %v602_v56 = vsel %vm538_vm3, %v380_v46, %v570_v50  ;;  %v618_v57 = vsel %vm554_vm4, %v460_v47, %v586_v51  ;;  %v395_v58 = vadd.f32 %v840_v54, %v1162_v39  ;;  %v389_v60 = vpop.f32.mrb[3].mxu0  ;;  %v469_v61 = vpop.f32.mrb[3].mxu1 }
  0xf5   : > { %v475_v59 = vadd.f32 %v864_v55, %v1162_v39  ;;  %634 = vst [vmem:[%s1170_s25] sm:$0xff] %v602_v56  ;;  %650 = vst [vmem:[%s1170_s25 + $0x80] sm:$0xff] %v618_v57  ;;  %v390_v62 = vadd.f32 %v1162_v39, %v389_v60  ;;  %v470_v63 = vadd.f32 %v1162_v39, %v469_v61 }
  0xf6   : > { %vm541_vm5 = vcmp.gt.f32.partialorder %v395_v58, 0.0  ;;  %v573_v0 = vmul.f32 0.2, %v395_v58  ;;  %v843_v6 = vpop.f32.mrb[4].mxu0  ;;  %v867_v7 = vpop.f32.mrb[4].mxu1 }
  0xf7   : > { %vm557_vm6 = vcmp.gt.f32.partialorder %v475_v59, 0.0  ;;  %v589_v1 = vmul.f32 0.2, %v475_v59  ;;  %vm540_vm7 = vcmp.gt.f32.partialorder %v390_v62, 0.0  ;;  %v572_v2 = vmul.f32 0.2, %v390_v62 }
  0xf8   : > { %vm556_vm8 = vcmp.gt.f32.partialorder %v470_v63, 0.0  ;;  %v588_v3 = vmul.f32 0.2, %v470_v63  ;;  %v605_v4 = vsel %vm541_vm5, %v395_v58, %v573_v0  ;;  %v405_v10 = vadd.f32 %v843_v6, %v1162_v39  ;;  %v399_v12 = vpop.f32.mrb[5].mxu0  ;;  %v479_v13 = vpop.f32.mrb[5].mxu1 }
  0xf9   : > { %v621_v5 = vsel %vm557_vm6, %v475_v59, %v589_v1  ;;  %637 = vst [vmem:[%s1170_s25 + $0x18] sm:$0xff] %v605_v4  ;;  %v604_v8 = vsel %vm540_vm7, %v390_v62, %v572_v2  ;;  %v485_v11 = vadd.f32 %v867_v7, %v1162_v39  ;;  %v400_v14 = vadd.f32 %v1162_v39, %v399_v12 }
  0xfa   : > { %653 = vst [vmem:[%s1170_s25 + $0x98] sm:$0xff] %v621_v5  ;;  %v620_v9 = vsel %vm556_vm8, %v470_v63, %v588_v3  ;;  %636 = vst [vmem:[%s1170_s25 + $0x10] sm:$0xff] %v604_v8  ;;  %v480_v15 = vadd.f32 %v1162_v39, %v479_v13  ;;  %v846_v16 = vpop.f32.mrb[6].mxu0  ;;  %v870_v17 = vpop.f32.mrb[6].mxu1  ;;  %vm543_vm9 = vcmp.gt.f32.partialorder %v405_v10, 0.0 }
  0xfb   : > { %652 = vst [vmem:[%s1170_s25 + $0x90] sm:$0xff] %v620_v9  ;;  %v575_v18 = vmul.f32 0.2, %v405_v10  ;;  %vm559_vm10 = vcmp.gt.f32.partialorder %v485_v11, 0.0  ;;  %v591_v19 = vmul.f32 0.2, %v485_v11  ;;  %v415_v24 = vadd.f32 %v846_v16, %v1162_v39 }
  0xfc   : > { %vm542_vm11 = vcmp.gt.f32.partialorder %v400_v14, 0.0  ;;  %v574_v20 = vmul.f32 0.2, %v400_v14  ;;  %vm558_vm12 = vcmp.gt.f32.partialorder %v480_v15, 0.0  ;;  %v590_v21 = vmul.f32 0.2, %v480_v15 }
  0xfd   : > { %v607_v22 = vsel %vm543_vm9, %v405_v10, %v575_v18  ;;  %v623_v23 = vsel %vm559_vm10, %v485_v11, %v591_v19  ;;  %v495_v25 = vadd.f32 %v870_v17, %v1162_v39  ;;  %v409_v26 = vpop.f32.mrb[7].mxu0  ;;  %v489_v27 = vpop.f32.mrb[7].mxu1  ;;  %vm545_vm13 = vcmp.gt.f32.partialorder %v415_v24, 0.0 }
  0xfe   : > { %639 = vst [vmem:[%s1170_s25 + $0x28] sm:$0xff] %v607_v22  ;;  %655 = vst [vmem:[%s1170_s25 + $0xa8] sm:$0xff] %v623_v23  ;;  %v606_v28 = vsel %vm542_vm11, %v400_v14, %v574_v20  ;;  %v622_v29 = vsel %vm558_vm12, %v480_v15, %v590_v21  ;;  %v410_v30 = vadd.f32 %v1162_v39, %v409_v26  ;;  %v849_v32 = vpop.f32.mrb[8].mxu0  ;;  %v873_v33 = vpop.f32.mrb[8].mxu1  ;;  %v577_v34 = vmul.f32 0.2, %v415_v24 }
  0xff   : > { %v490_v31 = vadd.f32 %v1162_v39, %v489_v27  ;;  %638 = vst [vmem:[%s1170_s25 + $0x20] sm:$0xff] %v606_v28  ;;  %654 = vst [vmem:[%s1170_s25 + $0xa0] sm:$0xff] %v622_v29  ;;  %vm561_vm14 = vcmp.gt.f32.partialorder %v495_v25, 0.0  ;;  %v593_v35 = vmul.f32 0.2, %v495_v25  ;;  %v425_v41 = vadd.f32 %v849_v32, %v1162_v39  ;;  %v419_v43 = vpop.f32.mrb[9].mxu0 }
 0x100   : > { %vm544_vm15 = vcmp.gt.f32.partialorder %v410_v30, 0.0  ;;  %v576_v36 = vmul.f32 0.2, %v410_v30  ;;  %v609_v38 = vsel %vm545_vm13, %v415_v24, %v577_v34  ;;  %v505_v42 = vadd.f32 %v873_v33, %v1162_v39  ;;  %v499_v44 = vpop.f32.mrb[9].mxu1 }
 0x101   : > { %vm560_vm0 = vcmp.gt.f32.partialorder %v490_v31, 0.0  ;;  %v592_v37 = vmul.f32 0.2, %v490_v31  ;;  %v625_v40 = vsel %vm561_vm14, %v495_v25, %v593_v35  ;;  %641 = vst [vmem:[%s1170_s25 + $0x38] sm:$0xff] %v609_v38  ;;  %v420_v47 = vadd.f32 %v1162_v39, %v419_v43 }
 0x102   : > { %657 = vst [vmem:[%s1170_s25 + $0xb8] sm:$0xff] %v625_v40  ;;  %v608_v45 = vsel %vm544_vm15, %v410_v30, %v576_v36  ;;  %v500_v48 = vadd.f32 %v1162_v39, %v499_v44  ;;  %v852_v49 = vpop.f32.mrb[10].mxu0  ;;  %v876_v50 = vpop.f32.mrb[10].mxu1  ;;  %vm547_vm1 = vcmp.gt.f32.partialorder %v425_v41, 0.0  ;;  %v579_v51 = vmul.f32 0.2, %v425_v41 }
 0x103   : > { %v624_v46 = vsel %vm560_vm0, %v490_v31, %v592_v37  ;;  %640 = vst [vmem:[%s1170_s25 + $0x30] sm:$0xff] %v608_v45  ;;  %vm563_vm2 = vcmp.gt.f32.partialorder %v505_v42, 0.0  ;;  %v595_v52 = vmul.f32 0.2, %v505_v42  ;;  %vm546_vm3 = vcmp.gt.f32.partialorder %v420_v47, 0.0  ;;  %v429_v59 = vpop.f32.mrb[11].mxu0 }
 0x104   : > { %656 = vst [vmem:[%s1170_s25 + $0xb0] sm:$0xff] %v624_v46  ;;  %v578_v53 = vmul.f32 0.2, %v420_v47  ;;  %vm562_vm4 = vcmp.gt.f32.partialorder %v500_v48, 0.0  ;;  %v594_v54 = vmul.f32 0.2, %v500_v48  ;;  %v611_v55 = vsel %vm547_vm1, %v425_v41, %v579_v51 }
 0x105   : > { %v627_v56 = vsel %vm563_vm2, %v505_v42, %v595_v52  ;;  %v435_v57 = vadd.f32 %v852_v49, %v1162_v39  ;;  %v515_v58 = vadd.f32 %v876_v50, %v1162_v39  ;;  %v509_v60 = vpop.f32.mrb[11].mxu1  ;;  %643 = vst [vmem:[%s1170_s25 + $0x48] sm:$0xff] %v611_v55  ;;  %v430_v63 = vadd.f32 %v1162_v39, %v429_v59 }
 0x106   : > { %659 = vst [vmem:[%s1170_s25 + $0xc8] sm:$0xff] %v627_v56  ;;  %v610_v61 = vsel %vm546_vm3, %v420_v47, %v578_v53  ;;  %v626_v62 = vsel %vm562_vm4, %v500_v48, %v594_v54  ;;  %v510_v0 = vadd.f32 %v1162_v39, %v509_v60  ;;  %v855_v1 = vpop.f32.mrb[12].mxu0  ;;  %v879_v2 = vpop.f32.mrb[12].mxu1 }
 0x107   : > { %642 = vst [vmem:[%s1170_s25 + $0x40] sm:$0xff] %v610_v61  ;;  %658 = vst [vmem:[%s1170_s25 + $0xc0] sm:$0xff] %v626_v62  ;;  %vm549_vm5 = vcmp.gt.f32.partialorder %v435_v57, 0.0  ;;  %v581_v3 = vmul.f32 0.2, %v435_v57  ;;  %vm565_vm6 = vcmp.gt.f32.partialorder %v515_v58, 0.0  ;;  %v445_v9 = vadd.f32 %v855_v1, %v1162_v39 }
 0x108   : > { %v597_v4 = vmul.f32 0.2, %v515_v58  ;;  %vm548_vm7 = vcmp.gt.f32.partialorder %v430_v63, 0.0  ;;  %v580_v5 = vmul.f32 0.2, %v430_v63  ;;  %vm564_vm8 = vcmp.gt.f32.partialorder %v510_v0, 0.0 }
 0x109   : > { %v596_v6 = vmul.f32 0.2, %v510_v0  ;;  %v613_v7 = vsel %vm549_vm5, %v435_v57, %v581_v3  ;;  %v525_v10 = vadd.f32 %v879_v2, %v1162_v39  ;;  %v439_v11 = vpop.f32.mrb[13].mxu0  ;;  %v519_v12 = vpop.f32.mrb[13].mxu1  ;;  %vm551_vm9 = vcmp.gt.f32.partialorder %v445_v9, 0.0 }
 0x10a   : > { %v629_v8 = vsel %vm565_vm6, %v515_v58, %v597_v4  ;;  %645 = vst [vmem:[%s1170_s25 + $0x58] sm:$0xff] %v613_v7  ;;  %v612_v13 = vsel %vm548_vm7, %v430_v63, %v580_v5  ;;  %v440_v15 = vadd.f32 %v1162_v39, %v439_v11  ;;  %v520_v16 = vadd.f32 %v1162_v39, %v519_v12  ;;  %v858_v17 = vpop.f32.mrb[14].mxu0  ;;  %v882_v18 = vpop.f32.mrb[14].mxu1 }
 0x10b   : > { %661 = vst [vmem:[%s1170_s25 + $0xd8] sm:$0xff] %v629_v8  ;;  %v628_v14 = vsel %vm564_vm8, %v510_v0, %v596_v6  ;;  %644 = vst [vmem:[%s1170_s25 + $0x50] sm:$0xff] %v612_v13  ;;  %v583_v19 = vmul.f32 0.2, %v445_v9  ;;  %vm567_vm10 = vcmp.gt.f32.partialorder %v525_v10, 0.0  ;;  %v455_v25 = vadd.f32 %v858_v17, %v1162_v39  ;;  %v449_v27 = vpop.f32.mrb[15].mxu0 }
 0x10c   : > { %660 = vst [vmem:[%s1170_s25 + $0xd0] sm:$0xff] %v628_v14  ;;  %v599_v20 = vmul.f32 0.2, %v525_v10  ;;  %vm550_vm11 = vcmp.gt.f32.partialorder %v440_v15, 0.0  ;;  %v582_v21 = vmul.f32 0.2, %v440_v15  ;;  %v535_v26 = vadd.f32 %v882_v18, %v1162_v39 }
 0x10d   : > { %vm566_vm12 = vcmp.gt.f32.partialorder %v520_v16, 0.0  ;;  %v598_v22 = vmul.f32 0.2, %v520_v16  ;;  %v615_v23 = vsel %vm551_vm9, %v445_v9, %v583_v19  ;;  %v529_v28 = vpop.f32.mrb[15].mxu1  ;;  %v450_v31 = vadd.f32 %v1162_v39, %v449_v27 }
 0x10e   : > { %v631_v24 = vsel %vm567_vm10, %v525_v10, %v599_v20  ;;  %647 = vst [vmem:[%s1170_s25 + $0x68] sm:$0xff] %v615_v23  ;;  %v614_v29 = vsel %vm550_vm11, %v440_v15, %v582_v21  ;;  %v530_v32 = vadd.f32 %v1162_v39, %v529_v28  ;;  %vm553_vm13 = vcmp.gt.f32.partialorder %v455_v25, 0.0 }
 0x10f   : > { %663 = vst [vmem:[%s1170_s25 + $0xe8] sm:$0xff] %v631_v24  ;;  %v630_v30 = vsel %vm566_vm12, %v520_v16, %v598_v22  ;;  %646 = vst [vmem:[%s1170_s25 + $0x60] sm:$0xff] %v614_v29  ;;  %v585_v33 = vmul.f32 0.2, %v455_v25  ;;  %vm569_vm14 = vcmp.gt.f32.partialorder %v535_v26, 0.0  ;;  %vm552_vm15 = vcmp.gt.f32.partialorder %v450_v31, 0.0 }
 0x110   : > { %662 = vst [vmem:[%s1170_s25 + $0xe0] sm:$0xff] %v630_v30  ;;  %v601_v34 = vmul.f32 0.2, %v535_v26  ;;  %v584_v35 = vmul.f32 0.2, %v450_v31  ;;  %vm568_vm0 = vcmp.gt.f32.partialorder %v530_v32, 0.0 }
 0x111   : > { %v600_v36 = vmul.f32 0.2, %v530_v32  ;;  %v617_v39 = vsel %vm553_vm13, %v455_v25, %v585_v33 }
 0x112   : > { %v633_v37 = vsel %vm569_vm14, %v535_v26, %v601_v34  ;;  %649 = vst [vmem:[%s1170_s25 + $0x78] sm:$0xff] %v617_v39  ;;  %v616_v38 = vsel %vm552_vm15, %v450_v31, %v584_v35 }
 0x113   : > { %665 = vst [vmem:[%s1170_s25 + $0xf8] sm:$0xff] %v633_v37  ;;  %v632_v40 = vsel %vm568_vm0, %v530_v32, %v600_v36  ;;  %648 = vst [vmem:[%s1170_s25 + $0x70] sm:$0xff] %v616_v38 }
 0x114   : > { %664 = vst [vmem:[%s1170_s25 + $0xf0] sm:$0xff] %v632_v40 }
 0x115   : > { %951 = shalt.err (!%p948_p3)
}
 0x116   : > { %s952_s8 = scalar_lea.hbm %s1233_s29, 4096  ;;  %s956_s11 = scalar_lea.hbm %s1287_s3, 8192 }
 0x117   : > { %p953_p4 = scmp.ne.s32.totalorder %s1233_s29, %s952_s8  ;;  %p957_p9 = scmp.lt.u32.totalorder %s1233_s29, %s1287_s3 }
 0x118   : > { %p958_p10 = scmp.lt.u32.totalorder %s956_s11, %s952_s8  ;;  %p960_p12 = scmp.lt.u32.totalorder %s952_s8, %s1233_s29 }
 0x119   : > { %p954_p7 = pnand %p953_p4, %p1063_p5 }
 0x11a   : > { %p959_p11 = por %p958_p10, %p957_p9 }
 0x11b   : > { %p955_p8 = pneg %p954_p7 }
 0x11c   : > { %p961_p13 = por %p960_p12, %p959_p11 }
 0x11e   : > { %p962_p0 = pnand %p961_p13, %p955_p8 }
 0x120   : > { %965 = shalt.err (!%p962_p0)
}
 0x121   : > { %s1003_s20 = smov 128   ;;  %s1004_s24 = smov 8  }
 0x122   : > { %897 = dma.vmem_to_hbm [thread:$0]  (%p1063_p5), %s1235_s27, 4096, %s1233_s29, %s1243_s30, %s1003_s20, %s1003_s20, %s1004_s24  }
 0x123 PF: > { %p903_p1 = scmp.ge.s32.totalorder %s1000_s15, 2  ;;  %s695_s25 = sand.u32 1, %s988_s12  }
 0x124   : > { %s696_s26 = scalar_lea.sflag [#allocation3], %s695_s25 }
 0x125   : > { %p900_p2 = pnand %p903_p1, %p1067_p6 }
 0x127   : > { %983 = dma.done.wait (!%p900_p2), %s696_s26, 4096  }
 0x128   : > { %985 = vsyncadd (!%p900_p2), %s696_s26, 4294963200  ;;  %p13_p3 = scmp.ge.s32.totalorder %s1050_s18, 4   ;;  %s1290_s12 = smov %s992_s13 }
 0x129   : > { %s1291_s13 = smov %s996_s14  ;;  %s1292_s14 = smov %s1061_s21 }
 0x12a   : > { %s1293_s15 = smov %s1050_s18  ;;  %15 = sbr.rel (!%p13_p3) target bundleno = 3 (0x3), region = 67 }
 0x131   :  { %701 = vsyncpa [#allocation3], 1 }
 0x132   :  { %703 = vsyncpa [#allocation3 + $0x1], 1 }

</bundles_post_ra>
